<compile_context>
chip_gen: v5e
topology: v5e:2x2
jax: 0.10.0
libtpu: 0.0.40
codegen_flags: <defaults>
</compile_context>

<pallas_src>
import jax
import jax.numpy as jnp
from jax import lax
from jax.experimental import pallas as pl
from jax.experimental.pallas import tpu as pltpu

BN_EPS = 1e-5


# ---------------------------------------------------------------------------
# Kernels
# ---------------------------------------------------------------------------
def _train_kernel(x_ref, a_ref, b_ref, wt_ref, cls_ref):
    """BN (pre-folded scale/shift) -> Linear, one P tile.

    x_ref:   [B, D]   f32 features (resident across P tiles)
    a_ref:   [1, D]   f32 folded BN scale  (gamma / sqrt(var + eps))
    b_ref:   [1, D]   f32 folded BN shift  (beta - mean * scale)
    wt_ref:  [D, tn]  bf16 classifier weight tile (transposed, lane-dense)
    cls_ref: [B, tn]  f32 cls_score output tile
    """
    bn = x_ref[...] * a_ref[...] + b_ref[...]                  # f32, VPU only
    cls_ref[...] = jnp.dot(
        bn.astype(jnp.bfloat16), wt_ref[...],
        preferred_element_type=jnp.float32,
    ).astype(cls_ref.dtype)


def _eval_kernel(x_ref, a_ref, b_ref, l2_ref):
    """BN (folded running stats) -> L2 normalize, one batch tile.

    x_ref:  [tb, D]  f32 feature rows
    a_ref:  [1, D]   f32 folded BN scale
    b_ref:  [1, D]   f32 folded BN shift
    l2_ref: [tb, D]  f32 l2-normalized bn_features
    """
    bn = x_ref[...] * a_ref[...] + b_ref[...]                  # f32 [tb, D]
    sumsq = jnp.sum(bn * bn, axis=1, keepdims=True)            # [tb, 1]
    # Module's Normalize has no eps: out = x / sum(x^2)^(1/2).
    l2_ref[...] = (bn * lax.rsqrt(sumsq)).astype(l2_ref.dtype)


# ---------------------------------------------------------------------------
# Tiling / spec helpers
# ---------------------------------------------------------------------------
def _pick_tile(total, candidates):
    """Largest candidate dividing `total`, preferring >=2 tiles (v7x megacore)."""
    divs = [c for c in candidates if total % c == 0]
    if not divs:
        return total
    for c in divs:
        if total // c >= 2:
            return c
    return divs[0]


def _weight_spec(d, tn, n_tiles):
    """Weight-tile BlockSpec; 3-deep buffering when the P grid is long."""
    if n_tiles >= 4 and hasattr(pl, "Buffered"):
        try:
            return pl.BlockSpec((d, tn), lambda j: (0, j),
                                pipeline_mode=pl.Buffered(3))
        except TypeError:
            pass
    return pl.BlockSpec((d, tn), lambda j: (0, j))


def _clamp_vmem(nbytes):
    # Stay above typical scoped defaults, below v7x's 64 MiB physical VMEM.
    return int(min(max(nbytes, 16 << 20), 56 << 20))


# ---------------------------------------------------------------------------
# Forward wrapper (reproduces Classifier.forward)
# ---------------------------------------------------------------------------
def classifier_forward(features, bn_weight, bn_bias, cls_weight, *,
                       training=True,
                       bn_running_mean=None, bn_running_var=None):
    """features: [B, D, 1, 1] (any trailing singleton dims), cls_weight: [P, D].

    training=True : returns (features, cls_score)
    training=False: returns l2_norm(bn_features) using running stats
    """
    B = features.shape[0]
    D = features.shape[1]
    x = features.reshape(B, D).astype(jnp.float32)   # reshape, not squeeze (B==1 safe)
    P = cls_weight.shape[0]

    if training:
        # PyTorch BatchNorm1d errors on batch size 1 in training mode.
        assert B >= 2, "BatchNorm1d training requires batch >= 2"

        # Fold biased batch statistics into one scale/shift in the wrapper
        # (cheap [B, D] reduce) -- keeps the per-tile kernel body off the XLU.
        mean = jnp.mean(x, axis=0, keepdims=True)                     # [1, D]
        var = jnp.mean(jnp.square(x - mean), axis=0, keepdims=True)   # [1, D]
        a = bn_weight.reshape(1, D).astype(jnp.float32) * lax.rsqrt(var + BN_EPS)
        b = bn_bias.reshape(1, D).astype(jnp.float32) - mean * a

        p_pad = ((P + 127) // 128) * 128
        tn = _pick_tile(p_pad, (1024, 512, 256, 128))
        n_p = p_pad // tn

        # Weight in bf16 (halves the dominant HBM stream, doubles MXU rate).
        w_t = cls_weight.T.astype(jnp.bfloat16)                       # [D, P]
        if p_pad != P:
            w_t = jnp.pad(w_t, ((0, 0), (0, p_pad - P)))

        n_buf_w = 3 if n_p >= 4 else 2
        vmem_need = (2 * B * D * 4            # resident x block (double-buffered)
                     + 2 * (2 * D * 4)        # a, b
                     + n_buf_w * D * tn * 2   # bf16 weight tiles
                     + 2 * B * tn * 4         # output tiles
                     + (4 << 20))             # internal scratch margin

        cls_full = pl.pallas_call(
            _train_kernel,
            out_shape=jax.ShapeDtypeStruct((B, p_pad), jnp.float32),
            grid_spec=pltpu.PrefetchScalarGridSpec(
                num_scalar_prefetch=0,
                grid=(n_p,),
                in_specs=[
                    pl.BlockSpec((B, D), lambda j: (0, 0)),   # x (resident)
                    pl.BlockSpec((1, D), lambda j: (0, 0)),   # a
                    pl.BlockSpec((1, D), lambda j: (0, 0)),   # b
                    _weight_spec(D, tn, n_p),                 # weight tile
                ],
                out_specs=pl.BlockSpec((B, tn), lambda j: (0, j)),
            ),
            compiler_params=pltpu.CompilerParams(
                dimension_semantics=("parallel",),
                vmem_limit_bytes=_clamp_vmem(vmem_need)),
            cost_estimate=pl.CostEstimate(
                flops=2 * B * D * p_pad,
                transcendentals=0,
                bytes_accessed=(B * D * 4 + 2 * D * 4
                                + D * p_pad * 2 + B * p_pad * 4)),
        )(x, a, b, w_t)

        cls_score = cls_full if p_pad == P else cls_full[:, :P]
        return features, cls_score

    # --- Eval branch: folded running-stat BN + L2 normalize ------------------
    if bn_running_mean is None:
        bn_running_mean = jnp.zeros((D,), dtype=jnp.float32)
    if bn_running_var is None:
        bn_running_var = jnp.ones((D,), dtype=jnp.float32)

    scale = (bn_weight.astype(jnp.float32)
             * lax.rsqrt(bn_running_var.astype(jnp.float32) + BN_EPS))
    shift = bn_bias.astype(jnp.float32) - bn_running_mean.astype(jnp.float32) * scale
    a = scale.reshape(1, D)
    b = shift.reshape(1, D)

    b_pad = ((B + 7) // 8) * 8
    x_eval = x if b_pad == B else jnp.pad(
        x, ((0, b_pad - B), (0, 0)), constant_values=1.0)   # pad rows sliced off
    tb = _pick_tile(b_pad, (1024, 512, 256, 128, 64, 32, 16, 8))
    n_b = b_pad // tb

    vmem_need = (2 * tb * D * 4 * 2     # x tile + out tile, double-buffered
                 + 2 * (2 * D * 4)      # a, b
                 + (4 << 20))

    l2_full = pl.pallas_call(
        _eval_kernel,
        out_shape=jax.ShapeDtypeStruct((b_pad, D), jnp.float32),
        grid_spec=pltpu.PrefetchScalarGridSpec(
            num_scalar_prefetch=0,
            grid=(n_b,),
            in_specs=[
                pl.BlockSpec((tb, D), lambda i: (i, 0)),
                pl.BlockSpec((1, D), lambda i: (0, 0)),
                pl.BlockSpec((1, D), lambda i: (0, 0)),
            ],
            out_specs=pl.BlockSpec((tb, D), lambda i: (i, 0)),
        ),
        compiler_params=pltpu.CompilerParams(
            dimension_semantics=("parallel",),
            vmem_limit_bytes=_clamp_vmem(vmem_need)),
        cost_estimate=pl.CostEstimate(
            flops=5 * b_pad * D,
            transcendentals=b_pad,
            bytes_accessed=4 * (2 * b_pad * D + 2 * D)),
    )(x_eval, a, b)

    return l2_full if b_pad == B else l2_full[:B]


# ---------------------------------------------------------------------------
# Self-test
# ---------------------------------------------------------------------------
if __name__ == "__main__":
    # Small shapes consistent with the module: pooled features [B, D, 1, 1].
    B, D, P = 8, 128, 16          # batch, feature dim, pid_num

    key = jax.random.PRNGKey(0)
    k_feat, k_w = jax.random.split(key)

    features = jax.random.normal(k_feat, (B, D, 1, 1), dtype=jnp.float32)

    # Param init mirroring the PyTorch init fns:
    #   BatchNorm1d (weights_init_kaiming): weight=1, bias=0
    #   Linear (weights_init_classifier):   normal(std=0.001), bias=False
    bn_weight = jnp.ones((D,), dtype=jnp.float32)
    bn_bias = jnp.zeros((D,), dtype=jnp.float32)
    cls_weight = 0.001 * jax.random.normal(k_w, (P, D), dtype=jnp.float32)

    # Training-mode forward: (features, cls_score).
    feats_out, cls_score = classifier_forward(
        features, bn_weight, bn_bias, cls_weight, training=True)
    jax.block_until_ready(cls_score)

    # Eval-mode forward: l2-normalized bn_features (running stats).
    l2_feat = classifier_forward(
        features, bn_weight, bn_bias, cls_weight, training=False)
    jax.block_until_ready(l2_feat)

    # Pure-JAX reference checks.
    x = features.reshape(B, D)
    mean = jnp.mean(x, axis=0, keepdims=True)
    var = jnp.mean((x - mean) ** 2, axis=0, keepdims=True)
    bn_ref = (x - mean) / jnp.sqrt(var + BN_EPS) * bn_weight + bn_bias
    cls_ref = bn_ref @ cls_weight.T
    assert cls_score.shape == (B, P)
    # bf16 MXU operands (f32 accumulation) -> loose tol vs. pure-f32 reference.
    assert jnp.allclose(cls_score, cls_ref, atol=2e-3, rtol=2e-2), \
        float(jnp.max(jnp.abs(cls_score - cls_ref)))
    assert feats_out.shape == features.shape and jnp.allclose(feats_out, features)

    bn_eval = x / jnp.sqrt(1.0 + BN_EPS)
    l2_ref = bn_eval / jnp.sqrt(jnp.sum(bn_eval ** 2, axis=1, keepdims=True))
    assert l2_feat.shape == (B, D)
    assert jnp.allclose(l2_feat, l2_ref, atol=2e-5, rtol=1e-4), \
        float(jnp.max(jnp.abs(l2_feat - l2_ref)))

    print("KERNEL_OK")
</pallas_src>

<mosaic_0001>
module attributes {stable_mosaic.version = 11 : i64} {
  func.func @_train_kernel(%arg0: i32, %arg1: memref<8x128xf32, #tpu.memory_space<vmem>>, %arg2: memref<1x128xf32, #tpu.memory_space<vmem>>, %arg3: memref<1x128xf32, #tpu.memory_space<vmem>>, %arg4: memref<128x128xbf16, #tpu.memory_space<vmem>>, %arg5: memref<8x128xf32, #tpu.memory_space<vmem>>) attributes {dimension_semantics = [#tpu.dimension_semantics<parallel>], iteration_bounds = array<i64: 1>, scalar_prefetch = 0 : i64, scratch_operands = 0 : i64, tpu.core_type = #tpu.core_type<tc>, window_params = [{pipeline_mode = #tpu.pipeline_mode<synchronous>, transform_indices = @transform_0, window_bounds = array<i64: 8, 128>}, {pipeline_mode = #tpu.pipeline_mode<synchronous>, transform_indices = @transform_1, window_bounds = array<i64: 1, 128>}, {pipeline_mode = #tpu.pipeline_mode<synchronous>, transform_indices = @transform_2, window_bounds = array<i64: 1, 128>}, {transform_indices = @transform_3, window_bounds = array<i64: 128, 128>}, {transform_indices = @transform_4, window_bounds = array<i64: 8, 128>}]} {
    %c0 = arith.constant 0 : index
    %c0_0 = arith.constant 0 : index
    %0 = vector.load %arg1[%c0, %c0_0] : memref<8x128xf32, #tpu.memory_space<vmem>>, vector<8x128xf32>
    %c0_1 = arith.constant 0 : index
    %c0_2 = arith.constant 0 : index
    %1 = vector.load %arg2[%c0_1, %c0_2] : memref<1x128xf32, #tpu.memory_space<vmem>>, vector<1x128xf32>
    %2 = vector.broadcast %1 : vector<1x128xf32> to vector<8x128xf32>
    %3 = arith.mulf %0, %2 : vector<8x128xf32>
    %c0_3 = arith.constant 0 : index
    %c0_4 = arith.constant 0 : index
    %4 = vector.load %arg3[%c0_3, %c0_4] : memref<1x128xf32, #tpu.memory_space<vmem>>, vector<1x128xf32>
    %5 = vector.broadcast %4 : vector<1x128xf32> to vector<8x128xf32>
    %6 = arith.addf %3, %5 : vector<8x128xf32>
    %7 = arith.truncf %6 : vector<8x128xf32> to vector<8x128xbf16>
    %c0_5 = arith.constant 0 : index
    %c0_6 = arith.constant 0 : index
    %8 = vector.load %arg4[%c0_5, %c0_6] : memref<128x128xbf16, #tpu.memory_space<vmem>>, vector<128x128xbf16>
    %cst = arith.constant dense<0.000000e+00> : vector<8x128xf32>
    %9 = tpu.matmul %7, %8, %cst {dimension_numbers = #tpu.dot_dimension_numbers<[1], [0], [0], [1], [0, 0, 1, 1], [], []>} : vector<8x128xbf16>, vector<128x128xbf16>, vector<8x128xf32> -> vector<8x128xf32>
    %c0_7 = arith.constant 0 : index
    %c0_8 = arith.constant 0 : index
    %10 = vector.load %arg5[%c0_7, %c0_8] : memref<8x128xf32, #tpu.memory_space<vmem>>, vector<8x128xf32>
    tpu.vector_store %arg5[%c0_7, %c0_8], %9 {strides = array<i32>} : memref<8x128xf32, #tpu.memory_space<vmem>>, vector<8x128xf32>,
    return
  }
  func.func @transform_0(%arg0: i32) -> (i32, i32) {
    %c0_i32 = arith.constant 0 : i32
    %c0_i32_0 = arith.constant 0 : i32
    %c0_i32_1 = arith.constant 0 : i32
    return %c0_i32, %c0_i32_0 : i32, i32
  }
  func.func @transform_1(%arg0: i32) -> (i32, i32) {
    %c0_i32 = arith.constant 0 : i32
    %c0_i32_0 = arith.constant 0 : i32
    %c0_i32_1 = arith.constant 0 : i32
    return %c0_i32, %c0_i32_0 : i32, i32
  }
  func.func @transform_2(%arg0: i32) -> (i32, i32) {
    %c0_i32 = arith.constant 0 : i32
    %c0_i32_0 = arith.constant 0 : i32
    %c0_i32_1 = arith.constant 0 : i32
    return %c0_i32, %c0_i32_0 : i32, i32
  }
  func.func @transform_3(%arg0: i32) -> (i32, i32) {
    %c0_i32 = arith.constant 0 : i32
    %c0_i32_0 = arith.constant 0 : i32
    return %c0_i32, %arg0 : i32, i32
  }
  func.func @transform_4(%arg0: i32) -> (i32, i32) {
    %c0_i32 = arith.constant 0 : i32
    %c0_i32_0 = arith.constant 0 : i32
    return %c0_i32, %arg0 : i32, i32
  }
}

</mosaic_0001>

<bundles_post_ra>
// kernel: tpu_custom_call.1
= control target key start
LH: loop header
LB: loop body
LE: loop exit
PB: predicated region body
PF: predicated region fallthrough
CT: control target
= control target key end

     0   :  { %9 = vsyncpa [#allocation3], 0  ;;  %s365_s0 = inlined_call_operand.hbm [shape: f32[8,128], index: 0, kind: input, shape index: {}]   ;;  %s366_s1 = inlined_call_operand.hbm [shape: f32[1,128], index: 1, kind: input, shape index: {}]   ;;  %s367_s2 = inlined_call_operand.vmem [shape: f32[1,128], index: 2, kind: input, shape index: {}]   ;;  %s368_s3 = inlined_call_operand.hbm [shape: bf16[128,128], index: 3, kind: input, shape index: {}]   ;;  %s369_s4 = inlined_call_operand.hbm [shape: f32[8,128], index: 4, kind: output, shape index: {}]  }
   0x1   :  { %10 = vsyncpa [#allocation6], 0  ;;  %s28_s17 = sshll.u32 %s366_s1, 4  ;;  %s29_s17 = int_to_ptr.hbm [resolvable:$true] %s28_s17 }
   0x2   :  { %11 = vsyncpa [#allocation4], 0  ;;  %s319_s18 = smov [#allocation5]   ;;  %s17_s22 = sshll.u32 %s365_s0, 4  ;;  %s18_s22 = int_to_ptr.hbm [resolvable:$true] %s17_s22 }
   0x3   :  { %s30_s19 = sshll.u32 %s319_s18, 4  ;;  %s320_s23 = smov [#allocation2]   ;;  %s31_s19 = int_to_ptr.vmem [resolvable:$true] %s30_s19 }
   0x4   :  { %33 = dma.hbm_to_vmem [thread:$0]  %s29_s17, 16, %s31_s19, [#allocation6]  }
   0x5   :  { %s19_s24 = sshll.u32 %s320_s23, 4  ;;  %s40_s27 = sshll.u32 %s368_s3, 4  ;;  %s20_s24 = int_to_ptr.vmem [resolvable:$true] %s19_s24  ;;  %s41_s27 = int_to_ptr.hbm [resolvable:$true] %s40_s27 }
   0x6   :  { %22 = dma.hbm_to_vmem [thread:$0]  %s18_s22, 128, %s20_s24, [#allocation3]  }
   0x7   :  { %s321_s1 = smov [#allocation7]   ;;  %s322_s29 = smov 64  }
   0x8   :  { %s42_s28 = sshll.u32 %s321_s1, 4  ;;  %s323_s30 = smov 4   ;;  %s43_s28 = int_to_ptr.vmem [resolvable:$true] %s42_s28 }
   0x9   :  { %48 = dma.hbm_to_vmem [thread:$0]  %s41_s27, 1024, %s43_s28, [#allocation6], %s322_s29, %s322_s29, %s323_s30  }
   0xa   :  { %313 = dma.done.wait [#allocation3], 128  }
   0xb   :  { %314 = vsyncadd [#allocation3], 4294967168 }
   0xc   :  { %315 = dma.done.wait [#allocation6], 1040  }
   0xd   :  { %316 = vsyncadd [#allocation6], 4294966256  ;;  %v208_v0 = vld [vmem:[#allocation7 + $0x38] sm:$0xff]  ;;  %v207_v1 = vld [vmem:[#allocation7 + $0x30] sm:$0xff]  ;;  %s324_s5 = smov [#allocation8]   ;;  %s158_s9 = sshll.u32 %s369_s4, 4  ;;  %s159_s9 = int_to_ptr.hbm [resolvable:$true] %s158_s9 }
   0xe   :  { %137 = vmatpush.bf16.msra.mxu0 %v208_v0  ;;  %v206_v2 = vld [vmem:[#allocation7 + $0x28] sm:$0xff]  ;;  %v205_v3 = vld [vmem:[#allocation7 + $0x20] sm:$0xff]  ;;  %v204_v4 = vld [vmem:[#allocation7 + $0x18] sm:$0xff]  ;;  %s156_s6 = sshll.u32 %s324_s5, 4  ;;  %s157_s6 = int_to_ptr.vmem [resolvable:$true] %s156_s6 }
   0xf   :  { %v215_v5 = vld [vmem:[#allocation5] ss:$0 sm:$0xff]  ;;  %v203_v6 = vld [vmem:[#allocation7 + $0x10] sm:$0xff]  ;;  %v202_v10 = vld [vmem:[#allocation7 + $0x8] sm:$0xff] }
  0x10   :  { %v61_v7 = vld [vmem:[#allocation2] sm:$0xff]  ;;  %v201_v12 = vld [vmem:[#allocation7] sm:$0xff] }
  0x11   :  { %v66_v8 = vmul.f32 %v215_v5, %v61_v7  ;;  %v216_v9 = vld [vmem:[%s367_s2] ss:$0 sm:$0xff] }
  0x12   :  { %138 = vmatpush.bf16.msra.mxu0 %v207_v1 }
  0x13   :  { %v71_v11 = vadd.f32 %v216_v9, %v66_v8 }
  0x15   :  { %v72_v13 = vpack.c.bf16 %v71_v11, %v71_v11 }
  0x16   :  { %139 = vmatpush.bf16.msra.mxu0 %v206_v2 }
  0x1a   :  { %140 = vmatpush.bf16.msra.mxu0 %v205_v3 }
  0x1e   :  { %141 = vmatpush.bf16.msra.mxu0 %v204_v4 }
  0x22   :  { %142 = vmatpush.bf16.msra.mxu0 %v203_v6 }
  0x26   :  { %143 = vmatpush.bf16.msra.mxu0 %v202_v10 }
  0x2a   :  { %144 = vmatpush.bf16.msra.mxu0 %v201_v12 }
  0x2d   :  { %145 = vmatmul.bf16.vlgmr.msra.gmra.mxu0 %v72_v13 }
  0xaa   :  { %v146_v14 = vpop.f32.mrf.mxu0 }
  0xab   :  { %150 = vst [vmem:[#allocation8] sm:$0xff] %v146_v14 }
  0xac   :  { %161 = dma.vmem_to_hbm [thread:$0]  %s157_s6, 128, %s159_s9, [#allocation4]  }
  0xb2   :  { %v148_v15 = vpop.f32.mrf.mxu0 }
  0xb3   :  { %317 = dma.done.wait [#allocation4], 128  }
  0xb4   :  { %318 = vsyncadd [#allocation4], 4294967168 }
  0xb5   :  { %166 = vsyncpa [#allocation3], 1 }
  0xb6   :  { %167 = vsyncpa [#allocation6], 1 }
  0xb7   :  { %168 = vsyncpa [#allocation4], 1 }

</bundles_post_ra>
